<compile_context>
chip_gen: v7x
topology: tpu7x:2x2x1
jax: 0.10.0
libtpu: 0.0.40
codegen_flags: <defaults>
</compile_context>

<pallas_src>
import functools
import math

import jax
import jax.numpy as jnp
from jax import lax
from jax.experimental import pallas as pl
from jax.experimental.pallas import tpu as pltpu


# ----------------------------- Pallas kernels ------------------------------


def _attn_ln1_kernel(x_ref, wqkv_ref, bqkv_ref, wo_ref, bo_ref,
                     biask_ref, keepq_ref, g_ref, be_ref,
                     o_ref, ctx_ref, *, nhead, eps):
    """One batch element: fused QKV proj + MHA + out_proj + residual + LN1."""
    x = x_ref[0]                                            # (S, D)
    d_model = x.shape[-1]
    hd = d_model // nhead

    # One wide projection: (S, D) @ (D, 3D).  The 1/sqrt(hd) softmax scale is
    # pre-folded into the q columns of wqkv / bqkv in the wrapper.
    qkv = (jnp.dot(x, wqkv_ref[...], preferred_element_type=jnp.float32)
           + bqkv_ref[...].astype(jnp.float32))
    qkv = qkv.astype(x.dtype)                               # native-dtype MXU feed

    bias_k = biask_ref[0]                                   # (1, S) additive mask

    # Per-head attention; context columns go into one (S, D) scratch so a single
    # (S, D) @ (D, D) out_proj runs afterwards with a full-width K dimension.
    # TODO(synk): flash-style KV tiling (online-softmax m/l scratch) for S >~ 1024
    #             instead of materializing the full (S, S) score tile.
    # TODO(synk): pair heads per column store when hd % 128 != 0 to avoid masked vst.
    for h in range(nhead):
        q = qkv[:, h * hd:(h + 1) * hd]
        k = qkv[:, d_model + h * hd:d_model + (h + 1) * hd]
        v = qkv[:, 2 * d_model + h * hd:2 * d_model + (h + 1) * hd]
        s = lax.dot_general(q, k, (((1,), (1,)), ((), ())),
                            preferred_element_type=jnp.float32)        # (S, S)
        s = s + bias_k                                      # mask padded keys
        m = jnp.max(s, axis=-1, keepdims=True)
        p = jnp.exp(s - m)
        denom = jnp.sum(p, axis=-1, keepdims=True)          # (S, 1), f32
        c = jnp.dot(p.astype(x.dtype), v,
                    preferred_element_type=jnp.float32)     # (S, hd)
        # Deferred softmax normalization; approx reciprocal uses the EUP slot.
        ctx_ref[:, h * hd:(h + 1) * hd] = c * pl.reciprocal(denom, approx=True)

    # Zero padded query rows (FlashMHA pad_input), then out_proj + residual + LN1.
    ctx = (ctx_ref[...] * keepq_ref[0]).astype(x.dtype)
    y = (jnp.dot(ctx, wo_ref[...], preferred_element_type=jnp.float32)
         + bo_ref[...].astype(jnp.float32) + x.astype(jnp.float32))
    mu = jnp.mean(y, axis=-1, keepdims=True)
    var = jnp.mean((y - mu) ** 2, axis=-1, keepdims=True)
    yn = (y - mu) * lax.rsqrt(var + eps)
    o_ref[0] = (yn * g_ref[...] + be_ref[...]).astype(o_ref.dtype)


def _ffn_ln2_kernel(x_ref, w1_ref, b1_ref, w2_ref, b2_ref, g_ref, be_ref,
                    o_ref, acc_ref, *, eps):
    """Row tile i, hidden tile j of LayerNorm(x + linear2(relu(linear1(x))))."""
    j = pl.program_id(1)

    @pl.when(j == 0)
    def _():
        acc_ref[...] = jnp.zeros_like(acc_ref)

    x = x_ref[...]                                          # (tm, D)
    hid = (jnp.dot(x, w1_ref[...], preferred_element_type=jnp.float32)
           + b1_ref[...].astype(jnp.float32))
    hid = jnp.maximum(hid, 0.0)                             # relu
    acc_ref[...] += jnp.dot(hid.astype(x.dtype), w2_ref[...],
                            preferred_element_type=jnp.float32)

    @pl.when(j == pl.num_programs(1) - 1)
    def _():
        y = acc_ref[...] + b2_ref[...].astype(jnp.float32) + x.astype(jnp.float32)
        mu = jnp.mean(y, axis=-1, keepdims=True)
        var = jnp.mean((y - mu) ** 2, axis=-1, keepdims=True)
        yn = (y - mu) * lax.rsqrt(var + eps)
        o_ref[...] = (yn * g_ref[...] + be_ref[...]).astype(o_ref.dtype)


# ------------------------------ Pallas wrappers -----------------------------


def _vmem_limit_bytes():
    """Generation-dependent scoped-VMEM budget (~75% of physical, <= 96 MiB)."""
    try:
        phys = int(pltpu.get_tpu_info().vmem_capacity_bytes)
    except Exception:                      # fallback if the query is unavailable
        phys = 128 * 1024 * 1024
    return min((phys * 3) // 4, 96 * 1024 * 1024)   # 96 MiB v5e/v6e, 48 MiB v7x


def _row_tile(m, cap=1024):
    """Largest row tile <= cap that divides m (multiple of 8, or full extent)."""
    for t in (1024, 512, 256, 128, 64, 32, 16, 8):
        if t <= cap and m % t == 0:
            return t
    return m   # full-extent block is always a legal BlockSpec


def _col_tile(n, cap=2048):
    """Largest lane tile <= cap that divides n (multiple of 128, or full extent)."""
    for t in (2048, 1024, 512, 256, 128):
        if t <= cap and n % t == 0:
            return t
    return n


def attention_block(src, wqkv, bqkv, wo, bo, bias_k, keep_q, g1, be1,
                    *, nhead, eps):
    """Fused QKV + MHA + out_proj + residual + LayerNorm1, grid = (B,)."""
    B, S, D = src.shape
    # TODO(synk): for v7x with B < 2, add a query-row "parallel" grid axis so the
    # second TensorCore gets work (keys/values would need a second full-S view).
    kernel = functools.partial(_attn_ln1_kernel, nhead=nhead, eps=eps)
    return pl.pallas_call(
        kernel,
        out_shape=jax.ShapeDtypeStruct((B, S, D), src.dtype),
        grid=(B,),
        in_specs=[
            pl.BlockSpec((1, S, D), lambda b: (b, 0, 0)),     # src
            pl.BlockSpec((D, 3 * D), lambda b: (0, 0)),       # wqkv (resident)
            pl.BlockSpec((1, 3 * D), lambda b: (0, 0)),       # bqkv
            pl.BlockSpec((D, D), lambda b: (0, 0)),           # wo   (resident)
            pl.BlockSpec((1, D), lambda b: (0, 0)),           # bo
            pl.BlockSpec((1, 1, S), lambda b: (b, 0, 0)),     # additive key mask
            pl.BlockSpec((1, S, 1), lambda b: (b, 0, 0)),     # query keep mask
            pl.BlockSpec((1, D), lambda b: (0, 0)),           # ln1 gamma
            pl.BlockSpec((1, D), lambda b: (0, 0)),           # ln1 beta
        ],
        out_specs=pl.BlockSpec((1, S, D), lambda b: (b, 0, 0)),
        scratch_shapes=[pltpu.VMEM((S, D), jnp.float32)],     # per-batch context
        compiler_params=pltpu.CompilerParams(
            dimension_semantics=("parallel",),
            vmem_limit_bytes=_vmem_limit_bytes()),
    )(src, wqkv, bqkv, wo, bo, bias_k, keep_q, g1, be1)


def ffn_block(x2d, w1, b1, w2, b2, g2, be2, *, eps):
    """Fused FFN + residual + LayerNorm2; grid = (row tiles, hidden tiles)."""
    M, D = x2d.shape
    F = w1.shape[1]
    tm = _row_tile(M)
    tf = _col_tile(F)
    kernel = functools.partial(_ffn_ln2_kernel, eps=eps)
    return pl.pallas_call(
        kernel,
        out_shape=jax.ShapeDtypeStruct((M, D), x2d.dtype),
        grid=(M // tm, F // tf),
        in_specs=[
            pl.BlockSpec((tm, D), lambda i, j: (i, 0)),       # x (residual too)
            pl.BlockSpec((D, tf), lambda i, j: (0, j)),       # w1 tile
            pl.BlockSpec((1, tf), lambda i, j: (0, j)),       # b1 tile
            pl.BlockSpec((tf, D), lambda i, j: (j, 0)),       # w2 tile
            pl.BlockSpec((1, D), lambda i, j: (0, 0)),        # b2
            pl.BlockSpec((1, D), lambda i, j: (0, 0)),        # ln2 gamma
            pl.BlockSpec((1, D), lambda i, j: (0, 0)),        # ln2 beta
        ],
        out_specs=pl.BlockSpec((tm, D), lambda i, j: (i, 0)),
        scratch_shapes=[pltpu.VMEM((tm, D), jnp.float32)],
        compiler_params=pltpu.CompilerParams(
            dimension_semantics=("parallel", "arbitrary"),
            vmem_limit_bytes=_vmem_limit_bytes()),
    )(x2d, w1, b1, w2, b2, g2, be2)


# --------------------------- full layer forward ------------------------------


def flash_transformer_encoder_layer(src, src_key_padding_mask, params, nhead,
                                    eps=1e-5):
    """Post-norm FlashTransformerEncoderLayer forward (inference).

    src: (B, S, D); src_key_padding_mask: (B, S) bool, True == pad.
    """
    # TODO(synk): dropout / dropout1 / dropout2 are identity here (eval mode);
    # training-mode stochastic dropout is not implemented.
    B, S, D = src.shape
    hd = D // nhead

    # Fold the softmax scale into the q columns (one-time, parameter-side op —
    # the "pre-scale in wrapper" anti-pattern only concerns activations).
    scale = 1.0 / math.sqrt(hd)
    col_scale = jnp.concatenate(
        [jnp.full((D,), scale, dtype=params["w_qkv"].dtype),
         jnp.ones((2 * D,), dtype=params["w_qkv"].dtype)])
    wqkv = params["w_qkv"] * col_scale[None, :]           # (D, 3D)
    bqkv = params["b_qkv"] * col_scale[None, :]           # (1, 3D)

    # key_padding_mask_ = ~src_key_padding_mask (keep-mask), built once.
    keep = (~src_key_padding_mask).astype(jnp.float32)    # (B, S)
    bias_k = ((1.0 - keep) * (-1e30))[:, None, :]         # (B, 1, S), f32
    keep_q = keep[:, :, None]                             # (B, S, 1)

    # --- Call 1: QKV + attention + out_proj + residual + norm1 (fused) ---
    h1 = attention_block(src, wqkv, bqkv, params["w_o"], params["b_o"],
                         bias_k, keep_q, params["g1"], params["be1"],
                         nhead=nhead, eps=eps)

    # --- Call 2: FFN + residual + norm2 (fused, F-tiled reduction) ---
    o2d = ffn_block(h1.reshape(B * S, D), params["w1"], params["b1"],
                    params["w2"], params["b2"], params["g2"], params["be2"],
                    eps=eps)
    return o2d.reshape(B, S, D)


# ------------------------------- jnp reference -------------------------------


def reference_forward(src, src_key_padding_mask, params, nhead):
    B, S, D = src.shape
    hd = D // nhead
    keep = (~src_key_padding_mask).astype(jnp.float32)
    x2d = src.reshape(B * S, D)
    qkv = x2d @ params["w_qkv"] + params["b_qkv"][0]
    qkv = qkv.reshape(B, S, 3, nhead, hd)
    q = jnp.transpose(qkv[:, :, 0], (0, 2, 1, 3))
    k = jnp.transpose(qkv[:, :, 1], (0, 2, 1, 3))
    v = jnp.transpose(qkv[:, :, 2], (0, 2, 1, 3))
    s = jnp.einsum("bhqd,bhkd->bhqk", q, k) / (hd ** 0.5)
    s = s + jnp.where(keep[:, None, None, :] > 0.5, 0.0, -1e30)
    p = jax.nn.softmax(s, axis=-1)
    attn = jnp.einsum("bhqk,bhkd->bhqd", p, v)
    attn = attn * keep[:, None, :, None]
    attn2d = jnp.transpose(attn, (0, 2, 1, 3)).reshape(B * S, D)

    def ln(x, g, b):
        mu = jnp.mean(x, -1, keepdims=True)
        var = jnp.mean((x - mu) ** 2, -1, keepdims=True)
        return (x - mu) * jax.lax.rsqrt(var + 1e-5) * g + b

    h = ln(x2d + attn2d @ params["w_o"] + params["b_o"][0],
           params["g1"][0], params["be1"][0])
    ff = jnp.maximum(h @ params["w1"] + params["b1"][0], 0.0) @ params["w2"] \
        + params["b2"][0]
    out = ln(h + ff, params["g2"][0], params["be2"][0])
    return out.reshape(B, S, D)


# ----------------------------------- main ------------------------------------


if __name__ == "__main__":
    B, S, D, H, F = 2, 8, 32, 4, 64  # batch, seq, d_model, nhead, dim_feedforward

    key = jax.random.PRNGKey(0)
    ks = jax.random.split(key, 8)

    def w(k, shape, scale=0.05):
        return (scale * jax.random.normal(k, shape)).astype(jnp.float32)

    params = {
        "w_qkv": w(ks[0], (D, 3 * D)),
        "b_qkv": w(ks[1], (1, 3 * D)),
        "w_o":   w(ks[2], (D, D)),
        "b_o":   w(ks[3], (1, D)),
        "w1":    w(ks[4], (D, F)),
        "b1":    w(ks[5], (1, F)),
        "w2":    w(ks[6], (F, D)),
        "b2":    jnp.zeros((1, D), jnp.float32),
        "g1":    jnp.ones((1, D), jnp.float32),
        "be1":   jnp.zeros((1, D), jnp.float32),
        "g2":    jnp.ones((1, D), jnp.float32),
        "be2":   jnp.zeros((1, D), jnp.float32),
    }

    src = jax.random.normal(ks[7], (B, S, D), dtype=jnp.float32)
    # True == padding (PyTorch convention); pad the tail of batch 1.
    src_key_padding_mask = jnp.zeros((B, S), dtype=bool).at[1, 6:].set(True)

    out = flash_transformer_encoder_layer(src, src_key_padding_mask, params, H)
    out = jax.block_until_ready(out)

    ref = reference_forward(src, src_key_padding_mask, params, H)
    assert out.shape == (B, S, D)
    # Tolerance accounts for the approx (EUP) reciprocal on the softmax denom.
    assert jnp.allclose(out, ref, rtol=2e-3, atol=2e-3), "mismatch vs jnp reference"

    print("KERNEL_OK")
</pallas_src>

<mosaic_0001>
module attributes {stable_mosaic.version = 11 : i64} {
  func.func @_attn_ln1_kernel(%arg0: i32, %arg1: memref<1x8x32xf32, #tpu.memory_space<vmem>>, %arg2: memref<32x96xf32, #tpu.memory_space<vmem>>, %arg3: memref<1x96xf32, #tpu.memory_space<vmem>>, %arg4: memref<32x32xf32, #tpu.memory_space<vmem>>, %arg5: memref<1x32xf32, #tpu.memory_space<vmem>>, %arg6: memref<1x1x8xf32, #tpu.memory_space<vmem>>, %arg7: memref<1x8x1xf32, #tpu.memory_space<vmem>>, %arg8: memref<1x32xf32, #tpu.memory_space<vmem>>, %arg9: memref<1x32xf32, #tpu.memory_space<vmem>>, %arg10: memref<1x8x32xf32, #tpu.memory_space<vmem>>, %arg11: memref<8x32xf32, #tpu.memory_space<vmem>>) attributes {dimension_semantics = [#tpu.dimension_semantics<parallel>], iteration_bounds = array<i64: 2>, scalar_prefetch = 0 : i64, scratch_operands = 1 : i64, tpu.core_type = #tpu.core_type<tc>, window_params = [{transform_indices = @transform_0, window_bounds = array<i64: 1, 8, 32>}, {pipeline_mode = #tpu.pipeline_mode<synchronous>, transform_indices = @transform_1, window_bounds = array<i64: 32, 96>}, {pipeline_mode = #tpu.pipeline_mode<synchronous>, transform_indices = @transform_2, window_bounds = array<i64: 1, 96>}, {pipeline_mode = #tpu.pipeline_mode<synchronous>, transform_indices = @transform_3, window_bounds = array<i64: 32, 32>}, {pipeline_mode = #tpu.pipeline_mode<synchronous>, transform_indices = @transform_4, window_bounds = array<i64: 1, 32>}, {transform_indices = @transform_5, window_bounds = array<i64: 1, 1, 8>}, {transform_indices = @transform_6, window_bounds = array<i64: 1, 8, 1>}, {pipeline_mode = #tpu.pipeline_mode<synchronous>, transform_indices = @transform_7, window_bounds = array<i64: 1, 32>}, {pipeline_mode = #tpu.pipeline_mode<synchronous>, transform_indices = @transform_8, window_bounds = array<i64: 1, 32>}, {transform_indices = @transform_9, window_bounds = array<i64: 1, 8, 32>}]} {
    %c0 = arith.constant 0 : index
    %c0_0 = arith.constant 0 : index
    %c0_1 = arith.constant 0 : index
    %0 = vector.load %arg1[%c0, %c0_0, %c0_1] : memref<1x8x32xf32, #tpu.memory_space<vmem>>, vector<1x8x32xf32>
    %1 = vector.shape_cast %0 : vector<1x8x32xf32> to vector<8x32xf32>
    %c0_2 = arith.constant 0 : index
    %c0_3 = arith.constant 0 : index
    %2 = vector.load %arg2[%c0_2, %c0_3] : memref<32x96xf32, #tpu.memory_space<vmem>>, vector<32x96xf32>
    %cst = arith.constant dense<0.000000e+00> : vector<8x96xf32>
    %3 = tpu.matmul %1, %2, %cst {dimension_numbers = #tpu.dot_dimension_numbers<[1], [0], [0], [1], [0, 0, 1, 1], [], []>} : vector<8x32xf32>, vector<32x96xf32>, vector<8x96xf32> -> vector<8x96xf32>
    %c0_4 = arith.constant 0 : index
    %c0_5 = arith.constant 0 : index
    %4 = vector.load %arg3[%c0_4, %c0_5] : memref<1x96xf32, #tpu.memory_space<vmem>>, vector<1x96xf32>
    %5 = vector.broadcast %4 : vector<1x96xf32> to vector<8x96xf32>
    %6 = arith.addf %3, %5 : vector<8x96xf32>
    %c0_6 = arith.constant 0 : index
    %c0_7 = arith.constant 0 : index
    %c0_8 = arith.constant 0 : index
    %7 = vector.load %arg6[%c0_6, %c0_7, %c0_8] : memref<1x1x8xf32, #tpu.memory_space<vmem>>, vector<1x1x8xf32>
    %8 = vector.shape_cast %7 : vector<1x1x8xf32> to vector<1x8xf32>
    %9 = vector.extract_strided_slice %6 {offsets = [0, 0], sizes = [8, 8], strides = [1, 1]} : vector<8x96xf32> to vector<8x8xf32>
    %10 = vector.extract_strided_slice %6 {offsets = [0, 32], sizes = [8, 8], strides = [1, 1]} : vector<8x96xf32> to vector<8x8xf32>
    %11 = vector.extract_strided_slice %6 {offsets = [0, 64], sizes = [8, 8], strides = [1, 1]} : vector<8x96xf32> to vector<8x8xf32>
    %cst_9 = arith.constant dense<0.000000e+00> : vector<8x8xf32>
    %12 = tpu.matmul %9, %10, %cst_9 {dimension_numbers = #tpu.dot_dimension_numbers<[1], [1], [0], [0], [0, 0, 1, 0], [], []>} : vector<8x8xf32>, vector<8x8xf32>, vector<8x8xf32> -> vector<8x8xf32>
    %13 = vector.broadcast %8 : vector<1x8xf32> to vector<8x8xf32>
    %14 = arith.addf %12, %13 : vector<8x8xf32>
    %cst_10 = arith.constant dense<0xFF800000> : vector<8xf32>
    %15 = vector.multi_reduction <maximumf>, %14, %cst_10 [1] : vector<8x8xf32> to vector<8xf32>
    %16 = vector.shape_cast %15 : vector<8xf32> to vector<8x1xf32>
    %17 = vector.broadcast %16 : vector<8x1xf32> to vector<8x8xf32>
    %18 = arith.subf %14, %17 : vector<8x8xf32>
    %19 = math.exp %18 : vector<8x8xf32>
    %cst_11 = arith.constant dense<0.000000e+00> : vector<8xf32>
    %20 = vector.multi_reduction <add>, %19, %cst_11 [1] : vector<8x8xf32> to vector<8xf32>
    %21 = vector.shape_cast %20 : vector<8xf32> to vector<8x1xf32>
    %cst_12 = arith.constant dense<0.000000e+00> : vector<8x8xf32>
    %22 = tpu.matmul %19, %11, %cst_12 {dimension_numbers = #tpu.dot_dimension_numbers<[1], [0], [0], [1], [0, 0, 1, 1], [], []>} : vector<8x8xf32>, vector<8x8xf32>, vector<8x8xf32> -> vector<8x8xf32>
    %23 = tpu.reciprocal %21 {approx = true} : vector<8x1xf32> -> vector<8x1xf32>
    %24 = vector.broadcast %23 : vector<8x1xf32> to vector<8x8xf32>
    %25 = arith.mulf %22, %24 : vector<8x8xf32>
    %c0_13 = arith.constant 0 : index
    %c0_14 = arith.constant 0 : index
    %26 = vector.load %arg11[%c0_13, %c0_14] : memref<8x32xf32, #tpu.memory_space<vmem>>, vector<8x8xf32>
    tpu.vector_store %arg11[%c0_13, %c0_14], %25 {strides = array<i32>} : memref<8x32xf32, #tpu.memory_space<vmem>>, vector<8x8xf32>,
    %27 = vector.extract_strided_slice %6 {offsets = [0, 8], sizes = [8, 8], strides = [1, 1]} : vector<8x96xf32> to vector<8x8xf32>
    %28 = vector.extract_strided_slice %6 {offsets = [0, 40], sizes = [8, 8], strides = [1, 1]} : vector<8x96xf32> to vector<8x8xf32>
    %29 = vector.extract_strided_slice %6 {offsets = [0, 72], sizes = [8, 8], strides = [1, 1]} : vector<8x96xf32> to vector<8x8xf32>
    %cst_15 = arith.constant dense<0.000000e+00> : vector<8x8xf32>
    %30 = tpu.matmul %27, %28, %cst_15 {dimension_numbers = #tpu.dot_dimension_numbers<[1], [1], [0], [0], [0, 0, 1, 0], [], []>} : vector<8x8xf32>, vector<8x8xf32>, vector<8x8xf32> -> vector<8x8xf32>
    %31 = vector.broadcast %8 : vector<1x8xf32> to vector<8x8xf32>
    %32 = arith.addf %30, %31 : vector<8x8xf32>
    %cst_16 = arith.constant dense<0xFF800000> : vector<8xf32>
    %33 = vector.multi_reduction <maximumf>, %32, %cst_16 [1] : vector<8x8xf32> to vector<8xf32>
    %34 = vector.shape_cast %33 : vector<8xf32> to vector<8x1xf32>
    %35 = vector.broadcast %34 : vector<8x1xf32> to vector<8x8xf32>
    %36 = arith.subf %32, %35 : vector<8x8xf32>
    %37 = math.exp %36 : vector<8x8xf32>
    %cst_17 = arith.constant dense<0.000000e+00> : vector<8xf32>
    %38 = vector.multi_reduction <add>, %37, %cst_17 [1] : vector<8x8xf32> to vector<8xf32>
    %39 = vector.shape_cast %38 : vector<8xf32> to vector<8x1xf32>
    %cst_18 = arith.constant dense<0.000000e+00> : vector<8x8xf32>
    %40 = tpu.matmul %37, %29, %cst_18 {dimension_numbers = #tpu.dot_dimension_numbers<[1], [0], [0], [1], [0, 0, 1, 1], [], []>} : vector<8x8xf32>, vector<8x8xf32>, vector<8x8xf32> -> vector<8x8xf32>
    %41 = tpu.reciprocal %39 {approx = true} : vector<8x1xf32> -> vector<8x1xf32>
    %42 = vector.broadcast %41 : vector<8x1xf32> to vector<8x8xf32>
    %43 = arith.mulf %40, %42 : vector<8x8xf32>
    %c0_19 = arith.constant 0 : index
    %c8 = arith.constant 8 : index
    %44 = vector.load %arg11[%c0_19, %c8] : memref<8x32xf32, #tpu.memory_space<vmem>>, vector<8x8xf32>
    tpu.vector_store %arg11[%c0_19, %c8], %43 {strides = array<i32>} : memref<8x32xf32, #tpu.memory_space<vmem>>, vector<8x8xf32>,
    %45 = vector.extract_strided_slice %6 {offsets = [0, 16], sizes = [8, 8], strides = [1, 1]} : vector<8x96xf32> to vector<8x8xf32>
    %46 = vector.extract_strided_slice %6 {offsets = [0, 48], sizes = [8, 8], strides = [1, 1]} : vector<8x96xf32> to vector<8x8xf32>
    %47 = vector.extract_strided_slice %6 {offsets = [0, 80], sizes = [8, 8], strides = [1, 1]} : vector<8x96xf32> to vector<8x8xf32>
    %cst_20 = arith.constant dense<0.000000e+00> : vector<8x8xf32>
    %48 = tpu.matmul %45, %46, %cst_20 {dimension_numbers = #tpu.dot_dimension_numbers<[1], [1], [0], [0], [0, 0, 1, 0], [], []>} : vector<8x8xf32>, vector<8x8xf32>, vector<8x8xf32> -> vector<8x8xf32>
    %49 = vector.broadcast %8 : vector<1x8xf32> to vector<8x8xf32>
    %50 = arith.addf %48, %49 : vector<8x8xf32>
    %cst_21 = arith.constant dense<0xFF800000> : vector<8xf32>
    %51 = vector.multi_reduction <maximumf>, %50, %cst_21 [1] : vector<8x8xf32> to vector<8xf32>
    %52 = vector.shape_cast %51 : vector<8xf32> to vector<8x1xf32>
    %53 = vector.broadcast %52 : vector<8x1xf32> to vector<8x8xf32>
    %54 = arith.subf %50, %53 : vector<8x8xf32>
    %55 = math.exp %54 : vector<8x8xf32>
    %cst_22 = arith.constant dense<0.000000e+00> : vector<8xf32>
    %56 = vector.multi_reduction <add>, %55, %cst_22 [1] : vector<8x8xf32> to vector<8xf32>
    %57 = vector.shape_cast %56 : vector<8xf32> to vector<8x1xf32>
    %cst_23 = arith.constant dense<0.000000e+00> : vector<8x8xf32>
    %58 = tpu.matmul %55, %47, %cst_23 {dimension_numbers = #tpu.dot_dimension_numbers<[1], [0], [0], [1], [0, 0, 1, 1], [], []>} : vector<8x8xf32>, vector<8x8xf32>, vector<8x8xf32> -> vector<8x8xf32>
    %59 = tpu.reciprocal %57 {approx = true} : vector<8x1xf32> -> vector<8x1xf32>
    %60 = vector.broadcast %59 : vector<8x1xf32> to vector<8x8xf32>
    %61 = arith.mulf %58, %60 : vector<8x8xf32>
    %c0_24 = arith.constant 0 : index
    %c16 = arith.constant 16 : index
    %62 = vector.load %arg11[%c0_24, %c16] : memref<8x32xf32, #tpu.memory_space<vmem>>, vector<8x8xf32>
    tpu.vector_store %arg11[%c0_24, %c16], %61 {strides = array<i32>} : memref<8x32xf32, #tpu.memory_space<vmem>>, vector<8x8xf32>,
    %63 = vector.extract_strided_slice %6 {offsets = [0, 24], sizes = [8, 8], strides = [1, 1]} : vector<8x96xf32> to vector<8x8xf32>
    %64 = vector.extract_strided_slice %6 {offsets = [0, 56], sizes = [8, 8], strides = [1, 1]} : vector<8x96xf32> to vector<8x8xf32>
    %65 = vector.extract_strided_slice %6 {offsets = [0, 88], sizes = [8, 8], strides = [1, 1]} : vector<8x96xf32> to vector<8x8xf32>
    %cst_25 = arith.constant dense<0.000000e+00> : vector<8x8xf32>
    %66 = tpu.matmul %63, %64, %cst_25 {dimension_numbers = #tpu.dot_dimension_numbers<[1], [1], [0], [0], [0, 0, 1, 0], [], []>} : vector<8x8xf32>, vector<8x8xf32>, vector<8x8xf32> -> vector<8x8xf32>
    %67 = vector.broadcast %8 : vector<1x8xf32> to vector<8x8xf32>
    %68 = arith.addf %66, %67 : vector<8x8xf32>
    %cst_26 = arith.constant dense<0xFF800000> : vector<8xf32>
    %69 = vector.multi_reduction <maximumf>, %68, %cst_26 [1] : vector<8x8xf32> to vector<8xf32>
    %70 = vector.shape_cast %69 : vector<8xf32> to vector<8x1xf32>
    %71 = vector.broadcast %70 : vector<8x1xf32> to vector<8x8xf32>
    %72 = arith.subf %68, %71 : vector<8x8xf32>
    %73 = math.exp %72 : vector<8x8xf32>
    %cst_27 = arith.constant dense<0.000000e+00> : vector<8xf32>
    %74 = vector.multi_reduction <add>, %73, %cst_27 [1] : vector<8x8xf32> to vector<8xf32>
    %75 = vector.shape_cast %74 : vector<8xf32> to vector<8x1xf32>
    %cst_28 = arith.constant dense<0.000000e+00> : vector<8x8xf32>
    %76 = tpu.matmul %73, %65, %cst_28 {dimension_numbers = #tpu.dot_dimension_numbers<[1], [0], [0], [1], [0, 0, 1, 1], [], []>} : vector<8x8xf32>, vector<8x8xf32>, vector<8x8xf32> -> vector<8x8xf32>
    %77 = tpu.reciprocal %75 {approx = true} : vector<8x1xf32> -> vector<8x1xf32>
    %78 = vector.broadcast %77 : vector<8x1xf32> to vector<8x8xf32>
    %79 = arith.mulf %76, %78 : vector<8x8xf32>
    %c0_29 = arith.constant 0 : index
    %c24 = arith.constant 24 : index
    %80 = vector.load %arg11[%c0_29, %c24] : memref<8x32xf32, #tpu.memory_space<vmem>>, vector<8x8xf32>
    tpu.vector_store %arg11[%c0_29, %c24], %79 {strides = array<i32>} : memref<8x32xf32, #tpu.memory_space<vmem>>, vector<8x8xf32>,
    %c0_30 = arith.constant 0 : index
    %c0_31 = arith.constant 0 : index
    %81 = vector.load %arg11[%c0_30, %c0_31] : memref<8x32xf32, #tpu.memory_space<vmem>>, vector<8x32xf32>
    %c0_32 = arith.constant 0 : index
    %c0_33 = arith.constant 0 : index
    %c0_34 = arith.constant 0 : index
    %82 = vector.load %arg7[%c0_32, %c0_33, %c0_34] : memref<1x8x1xf32, #tpu.memory_space<vmem>>, vector<1x8x1xf32>
    %83 = vector.shape_cast %82 : vector<1x8x1xf32> to vector<8x1xf32>
    %84 = vector.broadcast %83 : vector<8x1xf32> to vector<8x32xf32>
    %85 = arith.mulf %81, %84 : vector<8x32xf32>
    %c0_35 = arith.constant 0 : index
    %c0_36 = arith.constant 0 : index
    %86 = vector.load %arg4[%c0_35, %c0_36] : memref<32x32xf32, #tpu.memory_space<vmem>>, vector<32x32xf32>
    %cst_37 = arith.constant dense<0.000000e+00> : vector<8x32xf32>
    %87 = tpu.matmul %85, %86, %cst_37 {dimension_numbers = #tpu.dot_dimension_numbers<[1], [0], [0], [1], [0, 0, 1, 1], [], []>} : vector<8x32xf32>, vector<32x32xf32>, vector<8x32xf32> -> vector<8x32xf32>
    %c0_38 = arith.constant 0 : index
    %c0_39 = arith.constant 0 : index
    %88 = vector.load %arg5[%c0_38, %c0_39] : memref<1x32xf32, #tpu.memory_space<vmem>>, vector<1x32xf32>
    %89 = vector.broadcast %88 : vector<1x32xf32> to vector<8x32xf32>
    %90 = arith.addf %87, %89 : vector<8x32xf32>
    %91 = arith.addf %90, %1 : vector<8x32xf32>
    %cst_40 = arith.constant dense<0.000000e+00> : vector<8xf32>
    %92 = vector.multi_reduction <add>, %91, %cst_40 [1] : vector<8x32xf32> to vector<8xf32>
    %93 = vector.shape_cast %92 : vector<8xf32> to vector<8x1xf32>
    %cst_41 = arith.constant 3.200000e+01 : f32
    %94 = vector.broadcast %cst_41 : f32 to vector<8x1xf32>
    %95 = arith.divf %93, %94 : vector<8x1xf32>
    %96 = vector.broadcast %95 : vector<8x1xf32> to vector<8x32xf32>
    %97 = arith.subf %91, %96 : vector<8x32xf32>
    %98 = arith.mulf %97, %97 : vector<8x32xf32>
    %cst_42 = arith.constant dense<0.000000e+00> : vector<8xf32>
    %99 = vector.multi_reduction <add>, %98, %cst_42 [1] : vector<8x32xf32> to vector<8xf32>
    %100 = vector.shape_cast %99 : vector<8xf32> to vector<8x1xf32>
    %cst_43 = arith.constant 3.200000e+01 : f32
    %101 = vector.broadcast %cst_43 : f32 to vector<8x1xf32>
    %102 = arith.divf %100, %101 : vector<8x1xf32>
    %103 = vector.broadcast %95 : vector<8x1xf32> to vector<8x32xf32>
    %104 = arith.subf %91, %103 : vector<8x32xf32>
    %cst_44 = arith.constant 9.99999974E-6 : f32
    %105 = vector.broadcast %cst_44 : f32 to vector<8x1xf32>
    %106 = arith.addf %102, %105 : vector<8x1xf32>
    %107 = math.rsqrt %106 : vector<8x1xf32>
    %108 = vector.broadcast %107 : vector<8x1xf32> to vector<8x32xf32>
    %109 = arith.mulf %104, %108 : vector<8x32xf32>
    %c0_45 = arith.constant 0 : index
    %c0_46 = arith.constant 0 : index
    %110 = vector.load %arg8[%c0_45, %c0_46] : memref<1x32xf32, #tpu.memory_space<vmem>>, vector<1x32xf32>
    %111 = vector.broadcast %110 : vector<1x32xf32> to vector<8x32xf32>
    %112 = arith.mulf %109, %111 : vector<8x32xf32>
    %c0_47 = arith.constant 0 : index
    %c0_48 = arith.constant 0 : index
    %113 = vector.load %arg9[%c0_47, %c0_48] : memref<1x32xf32, #tpu.memory_space<vmem>>, vector<1x32xf32>
    %114 = vector.broadcast %113 : vector<1x32xf32> to vector<8x32xf32>
    %115 = arith.addf %112, %114 : vector<8x32xf32>
    %c0_49 = arith.constant 0 : index
    %c0_50 = arith.constant 0 : index
    %c0_51 = arith.constant 0 : index
    %116 = vector.load %arg10[%c0_49, %c0_50, %c0_51] : memref<1x8x32xf32, #tpu.memory_space<vmem>>, vector<1x8x32xf32>
    %117 = vector.shape_cast %116 : vector<1x8x32xf32> to vector<8x32xf32>
    %118 = vector.shape_cast %115 : vector<8x32xf32> to vector<1x8x32xf32>
    tpu.vector_store %arg10[%c0_49, %c0_50, %c0_51], %118 {strides = array<i32>} : memref<1x8x32xf32, #tpu.memory_space<vmem>>, vector<1x8x32xf32>,
    return
  }
  func.func @transform_0(%arg0: i32) -> (i32, i32, i32) {
    %c0_i32 = arith.constant 0 : i32
    %c0_i32_0 = arith.constant 0 : i32
    %c0_i32_1 = arith.constant 0 : i32
    return %arg0, %c0_i32, %c0_i32_0 : i32, i32, i32
  }
  func.func @transform_1(%arg0: i32) -> (i32, i32) {
    %c0_i32 = arith.constant 0 : i32
    %c0_i32_0 = arith.constant 0 : i32
    %c0_i32_1 = arith.constant 0 : i32
    return %c0_i32, %c0_i32_0 : i32, i32
  }
  func.func @transform_2(%arg0: i32) -> (i32, i32) {
    %c0_i32 = arith.constant 0 : i32
    %c0_i32_0 = arith.constant 0 : i32
    %c0_i32_1 = arith.constant 0 : i32
    return %c0_i32, %c0_i32_0 : i32, i32
  }
  func.func @transform_3(%arg0: i32) -> (i32, i32) {
    %c0_i32 = arith.constant 0 : i32
    %c0_i32_0 = arith.constant 0 : i32
    %c0_i32_1 = arith.constant 0 : i32
    return %c0_i32, %c0_i32_0 : i32, i32
  }
  func.func @transform_4(%arg0: i32) -> (i32, i32) {
    %c0_i32 = arith.constant 0 : i32
    %c0_i32_0 = arith.constant 0 : i32
    %c0_i32_1 = arith.constant 0 : i32
    return %c0_i32, %c0_i32_0 : i32, i32
  }
  func.func @transform_5(%arg0: i32) -> (i32, i32, i32) {
    %c0_i32 = arith.constant 0 : i32
    %c0_i32_0 = arith.constant 0 : i32
    %c0_i32_1 = arith.constant 0 : i32
    return %arg0, %c0_i32, %c0_i32_0 : i32, i32, i32
  }
  func.func @transform_6(%arg0: i32) -> (i32, i32, i32) {
    %c0_i32 = arith.constant 0 : i32
    %c0_i32_0 = arith.constant 0 : i32
    %c0_i32_1 = arith.constant 0 : i32
    return %arg0, %c0_i32, %c0_i32_0 : i32, i32, i32
  }
  func.func @transform_7(%arg0: i32) -> (i32, i32) {
    %c0_i32 = arith.constant 0 : i32
    %c0_i32_0 = arith.constant 0 : i32
    %c0_i32_1 = arith.constant 0 : i32
    return %c0_i32, %c0_i32_0 : i32, i32
  }
  func.func @transform_8(%arg0: i32) -> (i32, i32) {
    %c0_i32 = arith.constant 0 : i32
    %c0_i32_0 = arith.constant 0 : i32
    %c0_i32_1 = arith.constant 0 : i32
    return %c0_i32, %c0_i32_0 : i32, i32
  }
  func.func @transform_9(%arg0: i32) -> (i32, i32, i32) {
    %c0_i32 = arith.constant 0 : i32
    %c0_i32_0 = arith.constant 0 : i32
    %c0_i32_1 = arith.constant 0 : i32
    return %arg0, %c0_i32, %c0_i32_0 : i32, i32, i32
  }
}

</mosaic_0001>

<bundles_post_ra>
// kernel: tpu_custom_call.1
= control target key start
LH: loop header
LB: loop body
LE: loop exit
PB: predicated region body
PF: predicated region fallthrough
CT: control target
= control target key end

     0   :  { %s2775_s0 = inlined_call_operand.hbm [shape: f32[2,8,32], index: 0, kind: input, shape index: {}]   ;;  %s2776_s1 = inlined_call_operand.hbm [shape: f32[32,96], index: 1, kind: input, shape index: {}]   ;;  %s2777_s2 = inlined_call_operand.hbm [shape: f32[1,96], index: 2, kind: input, shape index: {}]   ;;  %s2778_s3 = inlined_call_operand.hbm [shape: f32[32,32], index: 3, kind: input, shape index: {}]   ;;  %s2779_s4 = inlined_call_operand.hbm [shape: f32[1,32], index: 4, kind: input, shape index: {}]   ;;  %s2780_s5 = inlined_call_operand.hbm [shape: f32[2,1,8], index: 5, kind: input, shape index: {}]   ;;  %s2781_s6 = inlined_call_operand.hbm [shape: f32[2,8,1], index: 6, kind: input, shape index: {}]   ;;  %s2782_s7 = inlined_call_operand.hbm [shape: f32[1,32], index: 7, kind: input, shape index: {}]   ;;  %s2783_s8 = inlined_call_operand.hbm [shape: f32[1,32], index: 8, kind: input, shape index: {}]   ;;  %s2784_s9 = inlined_call_operand.hbm [shape: f32[2,8,32], index: 9, kind: output, shape index: {}]  }
   0x1   :  { %2802 = sst [smem:[#allocation29_spill]] %s2776_s1 }
   0x2   :  { %2803 = sst [smem:[#allocation30_spill]] %s2778_s3 }
   0x3   :  { %2804 = sst [smem:[#allocation31_spill]] %s2780_s5 }
   0x4   :  { %2805 = sst [smem:[#allocation32_spill]] %s2782_s7 }
   0x5   :  { %2806 = sst [smem:[#allocation33_spill]] %s2784_s9 }
   0x6   :  { %14 = vsyncpa [#allocation4], 0 }
   0x7   :  { %16 = vsyncpa [#allocation4 + $0x1], 0 }
   0x8   :  { %17 = vsyncpa [#allocation7], 0 }
   0x9   :  { %18 = vsyncpa [#allocation10], 0 }
   0xa   :  { %19 = vsyncpa [#allocation13], 0 }
   0xb   :  { %21 = vsyncpa [#allocation13 + $0x1], 0 }
   0xc   :  { %22 = vsyncpa [#allocation16], 0 }
   0xd   :  { %23 = vsyncpa [#allocation5], 0 }
   0xe   :  { %25 = vsyncpa [#allocation5 + $0x1], 0  ;;  %s2297_s30 = smov 0   ;;  %s2299_s10 = smov 0  }
   0xf   :  { %s2301_s11 = smov 0   ;;  %s2303_s12 = smov 0  }
  0x10 LB: > { %2807 = sst [smem:[#allocation25_spill]] %s2211_s11  ;;  %s2217_s13 = smov [#allocation6]   ;;  %s2215_s12 = sphi %s2303_s12, %s2841_s12   ;;  %s2211_s11 = sphi %s2301_s11, %s2846_s11   ;;  %s2207_s10 = sphi %s2299_s10, %s2845_s10   ;;  %s2203_s30 = sphi %s2297_s30, %s2844_s30  }
  0x11   : > { %s278_s14 = sshll.u32 %s2217_s13, 4  ;;  %s2318_s15 = sadd.s32 4294967295, %s2215_s12   ;;  %s2323_s14 = int_to_ptr.vmem [resolvable:$true] %s278_s14 }
  0x12   : > { %p1573_p0 = scmp.ge.s32.totalorder %s2215_s12, 1  ;;  %p2788_p1 = scmp.eq.s32.totalorder %s2318_s15, 0 }
  0x13   : > { %p266_p2 = scmp.lt.s32.totalorder %s2215_s12, 3  ;;  %s2218_s17 = smov [#allocation9]  }
  0x14   : > { %s302_s18 = sshll.u32 %s2218_s17, 4  ;;  %s2219_s20 = smov [#allocation15]   ;;  %s2338_s18 = int_to_ptr.vmem [resolvable:$true] %s302_s18 }
  0x15   : > { %p2325_p3 = pnand %p1573_p0, %p266_p2  ;;  %s327_s21 = sshll.u32 %s2219_s20, 4  ;;  %s2340_s21 = int_to_ptr.vmem [resolvable:$true] %s327_s21 }
  0x16   : > { %s2810_s1 = sld [smem:[#allocation29_spill]] }
  0x17   : > { %s2808_s16 = scalar_select %p2325_p3, 1, 0 }
  0x18   : > { %p1751_p5 = pneg %p2325_p3 }
  0x1a   : > { %p2334_p6 = pnand %p1751_p5, %p2788_p1 }
  0x1c   : > { %s2809_s19 = scalar_select %p2334_p6, 1, 0 }
  0x1d   : > { %s1875_s24 = scalar_lea.hbm %s2810_s1, 512  ;;  %p2350_p8 = pneg %p2334_p6 }
  0x1e   : > { %p1876_p7 = scmp.ne.s32.totalorder %s2810_s1, %s1875_s24  ;;  %p1882_p11 = scmp.lt.u32.totalorder %s1875_s24, %s2810_s1 }
  0x1f   : > { %s2811_s27 = scalar_select %p2350_p8, 1, 0 }
  0x20   : > { %p1878_p9 = pnand %p2350_p8, %p1876_p7 }
  0x22   : > { %p1879_p10 = pneg %p1878_p9 }
  0x24   : > { %p1884_p12 = pnand %p1882_p11, %p1879_p10 }
  0x26   : > { %1887 = shalt.err (!%p1884_p12)
}
  0x27   : > { %s1888_s13 = scalar_lea.vmem %s2323_s14, 512  ;;  %p1896_p5 = scmp.lt.s32.totalorder %s2323_s14, %s2323_s14 }
  0x28   : > { %p1889_p13 = scmp.ne.s32.totalorder %s2323_s14, %s1888_s13  ;;  %p1897_p4 = scmp.lt.s32.totalorder %s1888_s13, %s1888_s13 }
  0x2a   : > { %p1891_p0 = pnand %p1889_p13, %p2350_p8  ;;  %p1898_p7 = por %p1897_p4, %p1896_p5 }
  0x2c   : > { %p1892_p2 = pneg %p1891_p0 }
  0x2e   : > { %p1899_p9 = pnand %p1898_p7, %p1892_p2 }
  0x30   : > { %1902 = shalt.err (!%p1899_p9)
}
  0x31   : > { %s2220_s17 = smov 128   ;;  %s2221_s20 = smov 8  }
  0x32   : > { %1754 = dma.hbm_to_vmem [thread:$0]  (!%p2334_p6), %s2810_s1, 512, %s2323_s14, [#allocation7], %s2220_s17, %s2220_s17, %s2221_s20  }
  0x33   : > { %s2812_s3 = sld [smem:[#allocation30_spill]] }
  0x39   : > { %s1903_s26 = scalar_lea.hbm %s2812_s3, 512 }
  0x3a   : > { %p1904_p4 = scmp.ne.s32.totalorder %s2812_s3, %s1903_s26  ;;  %p1910_p12 = scmp.lt.u32.totalorder %s1903_s26, %s2812_s3 }
  0x3c   : > { %p1906_p10 = pnand %p1904_p4, %p2350_p8 }
  0x3e   : > { %p1907_p11 = pneg %p1906_p10 }
  0x40   : > { %p1912_p13 = pnand %p1910_p12, %p1907_p11 }
  0x42   : > { %1915 = shalt.err (!%p1912_p13)
}
  0x43   : > { %s1916_s14 = scalar_lea.vmem %s2338_s18, 512  ;;  %p1924_p7 = scmp.lt.s32.totalorder %s2338_s18, %s2338_s18 }
  0x44   : > { %p1917_p0 = scmp.ne.s32.totalorder %s2338_s18, %s1916_s14  ;;  %p1925_p9 = scmp.lt.s32.totalorder %s1916_s14, %s1916_s14 }
  0x46   : > { %p1919_p2 = pnand %p1917_p0, %p2350_p8  ;;  %p1926_p4 = por %p1925_p9, %p1924_p7 }
  0x48   : > { %p1920_p5 = pneg %p1919_p2 }
  0x4a   : > { %p1927_p10 = pnand %p1926_p4, %p1920_p5 }
  0x4c   : > { %1930 = shalt.err (!%p1927_p10)
}
  0x4d   : > { %1760 = dma.hbm_to_vmem [thread:$0]  (!%p2334_p6), %s2812_s3, 512, %s2338_s18, [#allocation10], %s2220_s17, %s2220_s17, %s2221_s20  }
  0x4e   : > { %s2813_s7 = sld [smem:[#allocation32_spill]] }
  0x54   : > { %s1931_s25 = scalar_lea.hbm %s2813_s7, 16 }
  0x55   : > { %p1932_p11 = scmp.ne.s32.totalorder %s2813_s7, %s1931_s25  ;;  %p1938_p0 = scmp.lt.u32.totalorder %s1931_s25, %s2813_s7 }
  0x57   : > { %p1934_p12 = pnand %p1932_p11, %p2350_p8 }
  0x59   : > { %p1935_p13 = pneg %p1934_p12 }
  0x5b   : > { %p1940_p2 = pnand %p1938_p0, %p1935_p13 }
  0x5d   : > { %1943 = shalt.err (!%p1940_p2)
}
  0x5e   : > { %s1944_s18 = scalar_lea.vmem %s2340_s21, 16  ;;  %s1951_s17 = scalar_lea.vmem %s2340_s21, 32 }
  0x5f   : > { %p1945_p5 = scmp.ne.s32.totalorder %s2340_s21, %s1944_s18  ;;  %p1952_p4 = scmp.lt.s32.totalorder %s2340_s21, %s2340_s21 }
  0x60   : > { %p1953_p10 = scmp.lt.s32.totalorder %s1951_s17, %s1944_s18 }
  0x61   : > { %p1947_p7 = pnand %p1945_p5, %p2350_p8 }
  0x62   : > { %p1954_p11 = por %p1953_p10, %p1952_p4 }
  0x63   : > { %p1948_p9 = pneg %p1947_p7 }
  0x65   : > { %p1955_p12 = pnand %p1954_p11, %p1948_p9 }
  0x67   : > { %1958 = shalt.err (!%p1955_p12)
}
  0x68   : > { %1766 = dma.hbm_to_vmem [thread:$0]  (!%p2334_p6), %s2813_s7, 16, %s2340_s21, [#allocation16]  }
  0x69   : > { %s1572_s9 = sadd.s32 4294967294, %s2215_s12   ;;  %s2420_s22 = sadd.s32 1, %s2215_s12  }
  0x6a   : > { %2814 = sst [smem:[#allocation26_spill]] %s2420_s22  ;;  %s38_s23 = sadd.s32 1, %s2211_s11 }
  0x6b   : > { %s35_s24 = ssub.s32 %s2215_s12, %s2420_s22  ;;  %p45_p13 = scmp.ne.s32.totalorder %s2211_s11, %s2207_s10 }
  0x6c   : > { %p36_p0 = scmp.eq.s32.totalorder %s35_s24, 0  ;;  %p46_p2 = scmp.eq.s32.totalorder %s2215_s12, 0 }
  0x6d   : > { %p51_p5 = scmp.ne.s32.totalorder %s2207_s10, %s2203_s30  ;;  %p253_p7 = scmp.eq.s32.totalorder %s2318_s15, 1 }
  0x6e   : > { %s2432_s25 = scalar_select %p36_p0, %s2211_s11, %s38_s23  }
  0x6f   : > { %p47_p9 = por %p46_p2, %p45_p13  ;;  %p2436_p4 = por %p2788_p1, %p51_p5 }
  0x70   : > { %2815 = sst [smem:[#allocation27_spill]] %s2432_s25  ;;  %p2440_p10 = por %p253_p7, %p45_p13 }
  0x71   : > { %s2816_s21 = scalar_select %p2436_p4, 1, 0 }
  0x72   : > { %s2817_s26 = scalar_select %p2440_p10, 1, 0 }
  0x73   : > { %p259_p11 = scmp.eq.s32.totalorder %s1572_s9, 1  ;;  %p1790_p12 = scmp.lt.s32.totalorder %s2215_s12, 2 }
  0x74   : > { %s2446_s28 = sand.u32 1, %s2211_s11   ;;  %s367_s13 = sand.u32 1, %s2215_s12  }
  0x75   : > { %p2448_p3 = por %p259_p11, %p51_p5  ;;  %p2453_p0 = pnand %p1790_p12, %p47_p9 }
  0x76   : > { %s1583_s17 = sshll.u32 %s2215_s12, 4  ;;  %s2821_s5 = sld [smem:[#allocation31_spill]] }
  0x77   : > { %s2818_s29 = scalar_select %p2448_p3, 1, 0 }
  0x78   : > { %s2820_s18 = scalar_select %p2453_p0, 1, 0 }
  0x79   : > { %2819 = sst [smem:[#allocation28_spill]] %s2818_s29  ;;  %s370_s9 = scalar_lea.vmem [#allocation12], %s2446_s28 }
  0x7a   : > { %s377_s24 = sshll.u32 %s370_s9, 4  ;;  %s2222_s1 = smov [#allocation8]   ;;  %s2464_s24 = int_to_ptr.vmem [resolvable:$true] %s377_s24 }
  0x7b   : > { %s2466_s3 = sshll.u32 %s2222_s1, 4  ;;  %s2468_s7 = scalar_lea.sflag [#allocation13], %s367_s13  ;;  %s293_s3 = int_to_ptr.vmem [resolvable:$true] %s2466_s3 }
  0x7c   : > { %s2461_s23 = scalar_lea.hbm %s2821_s5, %s1583_s17  ;;  %p2474_p2 = pneg %p2453_p0 }
  0x7d   : > { %s1959_s25 = scalar_lea.hbm %s2461_s23, 16  ;;  %s1964_s9 = scalar_lea.hbm %s2821_s5, 32 }
  0x7e   : > { %p1960_p13 = scmp.ne.s32.totalorder %s2461_s23, %s1959_s25  ;;  %p1965_p9 = scmp.lt.u32.totalorder %s2461_s23, %s2821_s5 }
  0x7f   : > { %s2822_s20 = scalar_select %p2474_p2, 1, 0 }
  0x80   : > { %p1962_p5 = pnand %p2474_p2, %p1960_p13  ;;  %p1966_p11 = scmp.lt.u32.totalorder %s1964_s9, %s1959_s25 }
  0x81   : > { %p1968_p1 = scmp.lt.u32.totalorder %s1959_s25, %s2461_s23 }
  0x82   : > { %p1963_p7 = pneg %p1962_p5  ;;  %p1967_p12 = por %p1966_p11, %p1965_p9 }
  0x84   : > { %p1969_p3 = por %p1968_p1, %p1967_p12 }
  0x86   : > { %p1970_p10 = pnand %p1969_p3, %p1963_p7 }
  0x88   : > { %1973 = shalt.err (!%p1970_p10)
}
  0x89   : > { %s1974_s13 = scalar_lea.vmem %s2464_s24, 16  ;;  %s2223_s17 = smov [#allocation12]  }
  0x8a   : > { %p1975_p13 = scmp.ne.s32.totalorder %s2464_s24, %s1974_s13  ;;  %s1979_s14 = sshll.u32 %s2223_s17, 4  ;;  %s1980_s14 = int_to_ptr.vmem [resolvable:$false] %s1979_s14 }
  0x8b   : > { %s1981_s11 = scalar_lea.vmem %s1980_s14, 32  ;;  %p1982_p6 = scmp.lt.s32.totalorder %s2464_s24, %s1980_s14 }
  0x8c   : > { %p1977_p5 = pnand %p1975_p13, %p2474_p2  ;;  %p1983_p8 = scmp.lt.s32.totalorder %s1981_s11, %s1974_s13 }
  0x8e   : > { %p1978_p4 = pneg %p1977_p5  ;;  %p1984_p9 = por %p1983_p8, %p1982_p6 }
  0x90   : > { %p1985_p11 = pnand %p1984_p9, %p1978_p4 }
  0x92   : > { %1988 = shalt.err (!%p1985_p11)
}
  0x93   : > { %1776 = dma.hbm_to_vmem [thread:$0]  (!%p2453_p0), %s2461_s23, 16, %s2464_s24, %s2468_s7  }
  0x94   : > { %s1989_s1 = scalar_lea.hbm %s2777_s2, 16  ;;  %p2823_p3 = scmp.ne.s32.totalorder %s2811_s27, 0 }
  0x95   : > { %p1990_p1 = scmp.ne.s32.totalorder %s2777_s2, %s1989_s1  ;;  %p1996_p4 = scmp.lt.u32.totalorder %s1989_s1, %s2777_s2 }
  0x97   : > { %p1992_p6 = pnand %p1990_p1, %p2823_p3 }
  0x99   : > { %p1993_p8 = pneg %p1992_p6 }
  0x9b   : > { %p1998_p10 = pnand %p1996_p4, %p1993_p8 }
  0x9d   : > { %2001 = shalt.err (!%p1998_p10)
}
  0x9e   : > { %s2002_s11 = scalar_lea.vmem %s293_s3, 16  ;;  %s2009_s23 = scalar_lea.vmem %s293_s3, 32 }
  0x9f   : > { %p2003_p7 = scmp.ne.s32.totalorder %s293_s3, %s2002_s11  ;;  %p2010_p5 = scmp.lt.s32.totalorder %s293_s3, %s293_s3 }
  0xa0   : > { %p2011_p9 = scmp.lt.s32.totalorder %s2009_s23, %s2002_s11 }
  0xa1   : > { %p2005_p12 = pnand %p2003_p7, %p2823_p3 }
  0xa2   : > { %p2012_p11 = por %p2011_p9, %p2010_p5 }
  0xa3   : > { %p2006_p13 = pneg %p2005_p12 }
  0xa5   : > { %p2013_p0 = pnand %p2012_p11, %p2006_p13 }
  0xa7   : > { %2016 = shalt.err (!%p2013_p0)
}
  0xa8   : > { %p2824_p1 = scmp.ne.s32.totalorder %s2809_s19, 0  ;;  %s2224_s25 = smov [#allocation11]  }
  0xa9   : > { %s316_s9 = sshll.u32 %s2224_s25, 4  ;;  %s2225_s1 = smov [#allocation17]   ;;  %s317_s9 = int_to_ptr.vmem [resolvable:$true] %s316_s9 }
  0xaa   : > { %1757 = dma.hbm_to_vmem [thread:$0]  (!%p2824_p1), %s2777_s2, 16, %s293_s3, [#allocation7]  }
  0xab   : > { %s338_s17 = sshll.u32 %s2225_s1, 4  ;;  %s2017_s22 = scalar_lea.hbm %s2779_s4, 16  ;;  %s339_s17 = int_to_ptr.vmem [resolvable:$true] %s338_s17 }
  0xac   : > { %p2018_p0 = scmp.ne.s32.totalorder %s2779_s4, %s2017_s22  ;;  %p2024_p4 = scmp.lt.u32.totalorder %s2017_s22, %s2779_s4 }
  0xae   : > { %p2020_p6 = pnand %p2018_p0, %p2823_p3 }
  0xb0   : > { %p2021_p8 = pneg %p2020_p6 }
  0xb2   : > { %p2026_p10 = pnand %p2024_p4, %p2021_p8 }
  0xb4   : > { %2029 = shalt.err (!%p2026_p10)
}
  0xb5   : > { %s2030_s3 = scalar_lea.vmem %s317_s9, 16  ;;  %s2037_s24 = scalar_lea.vmem %s317_s9, 32 }
  0xb6   : > { %p2031_p7 = scmp.ne.s32.totalorder %s317_s9, %s2030_s3  ;;  %p2038_p5 = scmp.lt.s32.totalorder %s317_s9, %s317_s9 }
  0xb7   : > { %p2039_p9 = scmp.lt.s32.totalorder %s2037_s24, %s2030_s3 }
  0xb8   : > { %p2033_p12 = pnand %p2031_p7, %p2823_p3 }
  0xb9   : > { %p2040_p11 = por %p2039_p9, %p2038_p5 }
  0xba   : > { %p2034_p13 = pneg %p2033_p12 }
  0xbc   : > { %p2041_p2 = pnand %p2040_p11, %p2034_p13 }
  0xbe   : > { %2044 = shalt.err (!%p2041_p2)
}
  0xbf   : > { %1763 = dma.hbm_to_vmem [thread:$0]  (!%p2824_p1), %s2779_s4, 16, %s317_s9, [#allocation10]  }
  0xc0   : > { %s2045_s13 = scalar_lea.hbm %s2783_s8, 16 }
  0xc1   : > { %p2046_p0 = scmp.ne.s32.totalorder %s2783_s8, %s2045_s13  ;;  %p2052_p2 = scmp.lt.u32.totalorder %s2045_s13, %s2783_s8 }
  0xc3   : > { %p2048_p6 = pnand %p2046_p0, %p2823_p3 }
  0xc5   : > { %p2049_p8 = pneg %p2048_p6 }
  0xc7   : > { %p2054_p4 = pnand %p2052_p2, %p2049_p8 }
  0xc9   : > { %2057 = shalt.err (!%p2054_p4)
}
  0xca   : > { %s2058_s3 = scalar_lea.vmem %s339_s17, 16  ;;  %s2065_s9 = scalar_lea.vmem %s339_s17, 32 }
  0xcb   : > { %p2059_p10 = scmp.ne.s32.totalorder %s339_s17, %s2058_s3  ;;  %p2066_p13 = scmp.lt.s32.totalorder %s339_s17, %s339_s17 }
  0xcc   : > { %p2067_p5 = scmp.lt.s32.totalorder %s2065_s9, %s2058_s3 }
  0xcd   : > { %p2061_p7 = pnand %p2059_p10, %p2823_p3 }
  0xce   : > { %p2068_p9 = por %p2067_p5, %p2066_p13 }
  0xcf   : > { %p2062_p12 = pneg %p2061_p7 }
  0xd1   : > { %p2069_p11 = pnand %p2068_p9, %p2062_p12 }
  0xd3   : > { %2072 = shalt.err (!%p2069_p11)
}
  0xd4   : > { %1769 = dma.hbm_to_vmem [thread:$0]  (!%p2824_p1), %s2783_s8, 16, %s339_s17, [#allocation16]  }
  0xd5   : > { %s1581_s27 = sshll.u32 %s2446_s28, 3  ;;  %s1582_s1 = sshll.u32 %s2215_s12, 7 }
  0xd6   : > { %s2558_s13 = scalar_lea.hbm %s2775_s0, %s1582_s1  ;;  %s353_s19 = scalar_lea.vmem [#allocation3], %s1581_s27 }
  0xd7   : > { %s360_s14 = sshll.u32 %s353_s19, 4  ;;  %s2567_s17 = scalar_lea.hbm %s2781_s6, %s1582_s1  ;;  %s2562_s14 = int_to_ptr.vmem [resolvable:$true] %s360_s14 }
  0xd8   : > { %s350_s5 = scalar_lea.sflag [#allocation4], %s2446_s28  ;;  %s2073_s3 = scalar_lea.hbm %s2558_s13, 128 }
  0xd9   : > { %p2074_p3 = scmp.ne.s32.totalorder %s2558_s13, %s2073_s3  ;;  %p2825_p1 = scmp.ne.s32.totalorder %s2822_s20, 0 }
  0xda   : > { %s2078_s25 = scalar_lea.hbm %s2775_s0, 256  ;;  %p2079_p8 = scmp.lt.u32.totalorder %s2558_s13, %s2775_s0 }
  0xdb   : > { %p2076_p0 = pnand %p2074_p3, %p2825_p1  ;;  %p2080_p2 = scmp.lt.u32.totalorder %s2078_s25, %s2073_s3 }
  0xdc   : > { %p2082_p10 = scmp.lt.u32.totalorder %s2073_s3, %s2558_s13 }
  0xdd   : > { %p2077_p6 = pneg %p2076_p0  ;;  %p2081_p4 = por %p2080_p2, %p2079_p8 }
  0xdf   : > { %p2083_p7 = por %p2082_p10, %p2081_p4 }
  0xe1   : > { %p2084_p12 = pnand %p2083_p7, %p2077_p6 }
  0xe3   : > { %2087 = shalt.err (!%p2084_p12)
}
  0xe4   : > { %s2088_s1 = scalar_lea.vmem %s2562_s14, 128  ;;  %s2226_s19 = smov [#allocation3]  }
  0xe5   : > { %p2089_p13 = scmp.ne.s32.totalorder %s2562_s14, %s2088_s1  ;;  %s2093_s11 = sshll.u32 %s2226_s19, 4  ;;  %s2094_s11 = int_to_ptr.vmem [resolvable:$false] %s2093_s11 }
  0xe6   : > { %s2095_s23 = scalar_lea.vmem %s2094_s11, 256  ;;  %p2096_p11 = scmp.lt.s32.totalorder %s2562_s14, %s2094_s11 }
  0xe7   : > { %p2091_p5 = pnand %p2089_p13, %p2825_p1  ;;  %p2097_p3 = scmp.lt.s32.totalorder %s2095_s23, %s2088_s1 }
  0xe9   : > { %p2092_p9 = pneg %p2091_p5  ;;  %p2098_p0 = por %p2097_p3, %p2096_p11 }
  0xeb   : > { %p2099_p8 = pnand %p2098_p0, %p2092_p9 }
  0xed   : > { %2102 = shalt.err (!%p2099_p8)
}
  0xee   : > { %p2826_p6 = scmp.ne.s32.totalorder %s2820_s18, 0  ;;  %s388_s3 = scalar_lea.vmem [#allocation14], %s1581_s27 }
  0xef   : > { %s395_s9 = sshll.u32 %s388_s3, 4  ;;  %s2103_s24 = scalar_lea.hbm %s2567_s17, 128  ;;  %s396_s9 = int_to_ptr.vmem [resolvable:$true] %s395_s9 }
  0xf0   : > { %1773 = dma.hbm_to_vmem [thread:$0]  (!%p2826_p6), %s2558_s13, 128, %s2562_s14, %s350_s5  }
  0xf1   : > { %p2104_p2 = scmp.ne.s32.totalorder %s2567_s17, %s2103_s24  ;;  %s2108_s29 = scalar_lea.hbm %s2781_s6, 256 }
  0xf2   : > { %p2109_p7 = scmp.lt.u32.totalorder %s2567_s17, %s2781_s6  ;;  %p2110_p12 = scmp.lt.u32.totalorder %s2108_s29, %s2103_s24 }
  0xf3   : > { %p2106_p4 = pnand %p2104_p2, %p2825_p1  ;;  %p2112_p5 = scmp.lt.u32.totalorder %s2103_s24, %s2567_s17 }
  0xf4   : > { %p2111_p13 = por %p2110_p12, %p2109_p7 }
  0xf5   : > { %p2107_p10 = pneg %p2106_p4 }
  0xf6   : > { %p2113_p9 = por %p2112_p5, %p2111_p13 }
  0xf8   : > { %p2114_p11 = pnand %p2113_p9, %p2107_p10 }
  0xfa   : > { %2117 = shalt.err (!%p2114_p11)
}
  0xfb   : > { %s2118_s28 = scalar_lea.vmem %s396_s9, 128  ;;  %s2227_s27 = smov [#allocation14]  }
  0xfc   : > { %p2119_p3 = scmp.ne.s32.totalorder %s396_s9, %s2118_s28  ;;  %s2123_s13 = sshll.u32 %s2227_s27, 4  ;;  %s2124_s13 = int_to_ptr.vmem [resolvable:$false] %s2123_s13 }
  0xfd   : > { %s2125_s14 = scalar_lea.vmem %s2124_s13, 256  ;;  %p2126_p2 = scmp.lt.s32.totalorder %s396_s9, %s2124_s13 }
  0xfe   : > { %p2121_p0 = pnand %p2119_p3, %p2825_p1  ;;  %p2127_p4 = scmp.lt.s32.totalorder %s2125_s14, %s2118_s28 }
 0x100   : > { %p2122_p8 = pneg %p2121_p0  ;;  %p2128_p6 = por %p2127_p4, %p2126_p2 }
 0x102   : > { %p2129_p7 = pnand %p2128_p6, %p2122_p8 }
 0x104   : > { %2132 = shalt.err (!%p2129_p7)
}
 0x105   : > { %p2827_p12 = scmp.ne.s32.totalorder %s2820_s18, 0  ;;  %p2828_p10 = scmp.ne.s32.totalorder %s2808_s16, 0 }
 0x106   : > { %s2614_s20 = sand.u32 (!%p2828_p10), 1, %s2207_s10   ;;  %p2829_p1 = scmp.ne.s32.totalorder (!%p2828_p10), %s2816_s21, 0 }
 0x107   : > { %1779 = dma.hbm_to_vmem [thread:$0]  (!%p2827_p12), %s2567_s17, 128, %s396_s9, %s2468_s7  }
 0x108   : > { %404 = sbr.rel (%p2828_p10) target bundleno = 2274 (0x8e2), region = 56  ;;  %s2617_s5 = sshll.u32 (!%p2828_p10), %s2614_s20, 3 }
 0x109   : > { %s407_s11 = scalar_lea.sflag (!%p2828_p10), [#allocation4], %s2614_s20  ;;  %s410_s23 = scalar_lea.vmem (!%p2828_p10), [#allocation3], %s2617_s5 }
 0x10f   : > { %2178 = dma.done.wait (%p2829_p1), %s407_s11, 128  }
 0x110   : > { %2180 = vsyncadd (%p2829_p1), %s407_s11, 4294967168  ;;  %p2830_p6 = scmp.eq.s32.totalorder %s2318_s15, 0 }
 0x112   : > { %2182 = dma.done.wait (%p2830_p6), [#allocation7], 528   ;;  %p2831_p13 = pmov %p2830_p6 }
 0x113   : > { %p2832_p5 = pmov %p2830_p6 }
 0x114   : > { %2184 = vsyncadd (%p2831_p13), [#allocation7], 4294966768 }
 0x115   : > { %2186 = dma.done.wait (%p2832_p5), [#allocation10], 528   ;;  %p2833_p9 = pmov %p2832_p5 }
 0x116   : > { %s431_s7 = sand.u32 1, %s2318_s15   ;;  %s434_s18 = scalar_lea.vmem [#allocation12], %s2614_s20 }
 0x117   : > { %2188 = vsyncadd (%p2833_p9), [#allocation10], 4294966768  ;;  %s432_s16 = scalar_lea.sflag [#allocation13], %s431_s7 }
 0x118   : > { %2190 = dma.done.wait (%p2829_p1), %s432_s16, 144  }
 0x119   : > { %2192 = vsyncadd (%p2829_p1), %s432_s16, 4294967152  ;;  %s443_s17 = scalar_lea.vmem [#allocation14], %s2617_s5  ;;  %p2834_p11 = pmov %p2832_p5 }
 0x11a   : > { %p2835_p3 = pmov %p2832_p5 }
 0x11b   : > { %2194 = dma.done.wait (%p2834_p11), [#allocation16], 32  }
 0x11c   : > { %2196 = vsyncadd (%p2835_p3), [#allocation16], 4294967264  ;;  %v2228_v0 = vmov 0.0|0.0   ;;  %vm2229_vm0 = vmmov 0   ;;  %v2230_v1 = vmov 0.0   ;;  %v496_v2 = vld [vmem:[#allocation6] sm:$0xff] }
 0x11d   : > { %1707 = vmatprep.subr.bf16.mxu0 %v2228_v0  ;;  %1653 = vmatprep.mubr.msk.f32.mxu0 %vm2229_vm0, %v2230_v1  ;;  %v497_v3 = vld [vmem:[#allocation6 + $0x8] sm:$0xff]  ;;  %v498_v4 = vld [vmem:[#allocation6 + $0x10] sm:$0xff]  ;;  %v499_v6 = vld [vmem:[#allocation6 + $0x18] sm:$0xff]  ;;  %vm507_vm1 = vcmask 261120   ;;  %s2231_s21 = smov 64   ;;  %s2232_s3 = smov 96  }
 0x11e   : > { %1656 = vmatprep.subr.mxu1 %v2230_v1  ;;  %1658 = vmatprep.mubr.msk.f32.mxu1 %vm2229_vm0, %v2230_v1  ;;  %v1708_v5 = vpack.c.bf16 %v497_v3, %v496_v2  ;;  %v1711_v7 = vpack.c.bf16 %v499_v6, %v498_v4  ;;  %v2653_v8 = vld [vmem:[%s410_s23] sm:$0xff]  ;;  %v1596_v9 = vld [vmem:[#allocation8] ss:$0 sm:$0xff]  ;;  %s2233_s9 = smov 88   ;;  %s2234_s24 = smov 120   ;;  %vm591_vm2 = vcmask 64512  }
 0x11f   : > { %s2235_s25 = smov 80   ;;  %s2236_s22 = smov 112   ;;  %v1598_v21 = vld [vmem:[%s434_s18] ss:$0 sm:$0xff]  ;;  %v2242_v63 = vmov 0   ;;  %vm923_vm3 = vcmask 130112  }
 0x120   : > { %1709 = vmatpush3.bf16.msra.mxu0 %v1708_v5  ;;  %s2237_s29 = smov 72   ;;  %s2238_s1 = smov 104   ;;  %1856 = vset.pattern.permute.xlu0 %v2242_v63  ;;  %vm1094_vm4 = vcmask 195712   ;;  %vm1265_vm5 = vcmask 261312  }
 0x121   : > { %1710 = vmatprep.subr.bf16.mxu0 %v2228_v0  ;;  %s2239_s19 = smov 56   ;;  %s2240_s28 = smov 40  }
 0x122   : > { %s2241_s27 = smov 48   ;;  %s2243_s13 = smov 8  }
 0x123   : > { %s2244_s14 = smov 16   ;;  %s2245_s11 = smov 24  }
 0x124   : > { %1712 = vmatpush3.bf16.msra.mxu0 %v1711_v7  ;;  %s1616_s23 = sshll.u32 %s2318_s15, 7  ;;  %s494_s7 = scalar_lea.vmem [#allocation18], %s2617_s5 }
 0x125   : > { %1676 = vmatprep.subr.mxu0 %v2230_v1  ;;  %s1405_s16 = sshll.u32 %s494_s7, 4  ;;  %p2837_p8 = scmp.ne.s32.totalorder %s2817_s26, 0  ;;  %s2732_s16 = int_to_ptr.vmem [resolvable:$true] %s1405_s16 }
 0x126   : > { %s2246_s15 = smov [#allocation18]  }
 0x127   : > { %1654 = vmatmul.mubr.msk.f32.vlgmr.msra.gmra.mrb[0].mxu0 %vm507_vm1, %v2653_v8  ;;  %s2137_s5 = sshll.u32 %s2246_s15, 4  ;;  %s2138_s5 = int_to_ptr.vmem [resolvable:$false] %s2137_s5 }
 0x128   : > { %1678 = vmatprep.mubr.msk.f32.mxu0 %vm2229_vm0, %v2230_v1  ;;  %p2140_p7 = scmp.lt.s32.totalorder %s2732_s16, %s2138_s5 }
 0x1fa   : > { %v577_v10 = vpop.f32.mrb[0].mxu0 }
 0x1fb   : > { %v2660_v11 = vadd.f32 %v1596_v9, %v577_v10  ;;  %v1655_v12 = vpop.f32.mrb[1].mxu0  ;;  %v1276_v9 = vld [vmem:[#allocation9 + $0x8] sm:$0xff]  ;;  %v1277_v10 = vld [vmem:[#allocation9 + $0x10] sm:$0xff] }
 0x1fc   : > { %v1278_v12 = vld [vmem:[#allocation9 + $0x18] sm:$0xff] }
 0x1fd   : > { %675 = vrot.lane.b32.xlu1 %v2660_v11, %s2231_s21  ;;  %589 = vrot.lane.b32.xlu0 %v2660_v11, %s2232_s3  ;;  %s2836_s21 = sld [smem:[#allocation33_spill]] }
 0x201   : > { %756 = vrot.lane.b32.xlu1 %v2660_v11, %s2233_s9  ;;  %s1392_s9 = scalar_lea.sflag [#allocation5], %s2614_s20 }
 0x203   : > { %s2730_s3 = scalar_lea.hbm %s2836_s21, %s1616_s23 }
 0x205   : > { %754 = vrot.lane.b32.xlu1 %v2660_v11, %s2234_s24  ;;  %s2133_s24 = scalar_lea.vmem %s2732_s16, 128 }
 0x206   : > { %p2134_p0 = scmp.ne.s32.totalorder %s2732_s16, %s2133_s24 }
 0x208   : > { %p2135_p2 = pnand %p2134_p0, %p2837_p8 }
 0x209   : > { %927 = vrot.lane.b32.xlu1 %v2660_v11, %s2235_s25  ;;  %s2139_s25 = scalar_lea.vmem %s2138_s5, 256 }
 0x20a   : > { %p2136_p4 = pneg %p2135_p2  ;;  %p2141_p12 = scmp.lt.s32.totalorder %s2139_s25, %s2133_s24 }
 0x20c   : > { %p2142_p10 = por %p2141_p12, %p2140_p7 }
 0x20d   : > { %925 = vrot.lane.b32.xlu1 %v2660_v11, %s2236_s22 }
 0x20e   : > { %p2143_p1 = pnand %p2142_p10, %p2136_p4 }
 0x211   : > { %1098 = vrot.lane.b32.xlu1 %v2660_v11, %s2237_s29 }
 0x215   : > { %1096 = vrot.lane.b32.xlu1 %v2660_v11, %s2238_s1 }
 0x26f   : > { %v676_v13 = vpop.permute.xlu1 %675  ;;  %v590_v14 = vpop.permute.xlu0 %589 }
 0x270   : > { %1657 = vmatpush3.xpose.msk.msra.mxu1 %vm591_vm2, %v590_v14 }
 0x271   : > { %1661 = vmatprep.subr.mxu1 %v2230_v1 }
 0x273   : > { %v757_v15 = vpop.permute.xlu1 %756  ;;  %1659 = vmatmul.mubr.msk.f32.vlgmr.msra.gmra.mrb[0].mxu1 %vm591_vm2, %v2660_v11 }
 0x274   : > { %1662 = vmatpush3.msra.mxu1 %v676_v13  ;;  %1663 = vmatprep.mubr.msk.f32.mxu1 %vm2229_vm0, %v2230_v1 }
 0x275   : > { %1666 = vmatprep.subr.mxu1 %v2230_v1 }
 0x277   : > { %v755_v16 = vpop.permute.xlu1 %754 }
 0x27b   : > { %v928_v17 = vpop.permute.xlu1 %927 }
 0x27c   : > { %1677 = vmatpush3.xpose.msk.msra.mxu0 %vm591_vm2, %v928_v17  ;;  %v1717_v17 = vpack.c.bf16 %v1278_v12, %v1277_v10 }
 0x27d   : > { %1686 = vmatprep.subr.mxu0 %v2230_v1 }
 0x27f   : > { %v926_v18 = vpop.permute.xlu1 %925 }
 0x280   : > { %1679 = vmatmul.mubr.msk.f32.vlgmr.msra.gmra.mrb[2].mxu0 %vm591_vm2, %v926_v18 }
 0x281   : > { %1688 = vmatprep.mubr.msk.f32.mxu0 %vm2229_vm0, %v2230_v1 }
 0x283   : > { %v1099_v19 = vpop.permute.xlu1 %1098 }
 0x284   : > { %1687 = vmatpush3.xpose.msk.msra.mxu0 %vm591_vm2, %v1099_v19 }
 0x285   : > { %1713 = vmatprep.subr.bf16.mxu0 %v2228_v0 }
 0x287   : > { %v1097_v20 = vpop.permute.xlu1 %1096 }
 0x288   : > { %1689 = vmatmul.mubr.msk.f32.vlgmr.msra.gmra.mrb[4].mxu0 %vm591_vm2, %v1097_v20 }
 0x289   : > { %1704 = vmatprep.mubr.msk.f32.mxu0 %vm2229_vm0, %v2230_v1 }
 0x346   : > { %v662_v22 = vpop.f32.mrb[0].mxu1 }
 0x347   : > { %v663_v23 = vadd.f32 %v1598_v21, %v662_v22  ;;  %v1660_v24 = vpop.f32.mrb[1].mxu1 }
 0x349   : > { %v666_v25 = vsel %vm591_vm2, %v663_v23, -inf }
 0x34a   : > { %667 = vmax.xlane.f32.xlu0 %v666_v25 }
 0x353   : > { %v999_v26 = vpop.f32.mrb[2].mxu0 }
 0x354   : > { %v1680_v27 = vpop.f32.mrb[3].mxu0  ;;  %v1000_v30 = vadd.f32 %v1598_v21, %v999_v26  ;;  %v1268_v26 = vld [vmem:[%s443_s17] sm:$0xff] }
 0x356   : > { %v1003_v32 = vsel %vm591_vm2, %v1000_v30, -inf }
 0x35b   : > { %v1170_v28 = vpop.f32.mrb[4].mxu0 }
 0x35c   : > { %v1690_v29 = vpop.f32.mrb[5].mxu0  ;;  %v1171_v31 = vadd.f32 %v1598_v21, %v1170_v28 }
 0x35e   : > { %v1174_v33 = vsel %vm591_vm2, %v1171_v31, -inf }
 0x360   : > { %841 = vrot.lane.b32.xlu0 %v2660_v11, %s2239_s19 }
 0x37f   : > { %1004 = vmax.xlane.f32.xlu0 %v1003_v32  ;;  %v1611_v32 = vld [vmem:[#allocation11] ss:$0 sm:$0xff] }
 0x383   : > { %1175 = vmax.xlane.f32.xlu0 %v1174_v33 }
 0x399   : > { %1183 = vrot.lane.b32.xlu0 %v2660_v11, %s2240_s28 }
 0x3d7   : > { %v668_v34 = vpop.xlane.xlu0 %667 }
 0x3d8   : > { %v669_v35 = vsub.f32 %v663_v23, %v668_v34 }
 0x3da   : > { %v670_v36 = vmul.f32 1.442695, %v669_v35 }
 0x3db   : > { %v842_v38 = vpop.permute.xlu0 %841 }
 0x3dc   : > { %1857 = vpow2.f32 %v670_v36 }
 0x3e6   : > { %v1858_v37 = vpop.eup %1857 }
 0x3e7   : > { %1664 = vmatmul.mubr.msk.f32.vlgmr.msra.gmra.mrb[2].mxu1 %vm591_vm2, %v1858_v37  ;;  %v672_v62 = vsel %vm591_vm2, %v1858_v37, 0.0 }
 0x3e8   : > { %1667 = vmatpush3.xpose.msk.msra.mxu1 %vm591_vm2, %v757_v15  ;;  %1668 = vmatprep.mubr.msk.f32.mxu1 %vm2229_vm0, %v2230_v1 }
 0x3e9   : > { %1671 = vmatprep.subr.mxu1 %v2230_v1 }
 0x3eb   : > { %1669 = vmatmul.mubr.msk.f32.vlgmr.msra.gmra.mrb[4].mxu1 %vm591_vm2, %v755_v16 }
 0x3ec   : > { %1672 = vmatpush3.msra.mxu1 %v842_v38  ;;  %1673 = vmatprep.mubr.msk.f32.mxu1 %vm2229_vm0, %v2230_v1 }
 0x3ed   : > { %1681 = vmatprep.subr.mxu1 %v2230_v1 }
 0x40c   : > { %v1005_v45 = vpop.xlane.xlu0 %1004 }
 0x40d   : > { %v1006_v46 = vsub.f32 %v1000_v30, %v1005_v45 }
 0x40f   : > { %v1007_v47 = vmul.f32 1.442695, %v1006_v46 }
 0x410   : > { %v1176_v50 = vpop.xlane.xlu0 %1175 }
 0x411   : > { %1859 = vpow2.f32 %v1007_v47  ;;  %v1177_v51 = vsub.f32 %v1171_v31, %v1176_v50 }
 0x413   : > { %v1178_v54 = vmul.f32 1.442695, %v1177_v51 }
 0x414   : > { %v1184_v60 = vpop.permute.xlu0 %1183 }
 0x41b   : > { %v1860_v48 = vpop.eup %1859 }
 0x41c   : > { %v1009_v49 = vsel %vm591_vm2, %v1860_v48, 0.0 }
 0x4ba   : > { %v747_v39 = vpop.f32.mrb[2].mxu1 }
 0x4bb   : > { %v1665_v40 = vpop.f32.mrb[3].mxu1 }
 0x4be   : > { %v828_v41 = vpop.f32.mrb[4].mxu1 }
 0x4bf   : > { %v829_v42 = vadd.f32 %v1598_v21, %v828_v41  ;;  %v1670_v43 = vpop.f32.mrb[5].mxu1 }
 0x4c1   : > { %v832_v44 = vsel %vm591_vm2, %v829_v42, -inf }
 0x4c2   : > { %833 = vmax.xlane.f32.xlu1 %v832_v44 }
 0x4d3   : > { %1012 = vrot.lane.b32.xlu1 %v2660_v11, %s2241_s27 }
 0x4f7   : > { %1010 = vadd.xlane.f32.xlu1 %v1009_v49 }
 0x54f   : > { %v834_v52 = vpop.xlane.xlu1 %833 }
 0x550   : > { %v835_v53 = vsub.f32 %v829_v42, %v834_v52 }
 0x552   : > { %v836_v55 = vmul.f32 1.442695, %v835_v53 }
 0x553   : > { %v1013_v57 = vpop.permute.xlu1 %1012 }
 0x554   : > { %1861 = vpow2.f32 %v836_v55 }
 0x555   : > { %1863 = vpow2.f32 %v1178_v54 }
 0x55e   : > { %v1862_v56 = vpop.eup %1861 }
 0x55f   : > { %1674 = vmatmul.mubr.msk.f32.vlgmr.msra.gmra.mrb[6].mxu1 %vm591_vm2, %v1862_v56  ;;  %v838_v58 = vsel %vm591_vm2, %v1862_v56, 0.0  ;;  %v1864_v59 = vpop.eup %1863 }
 0x560   : > { %1682 = vmatpush3.msra.mxu1 %v1013_v57  ;;  %839 = vadd.xlane.f32.xlu0 %v838_v58  ;;  %v1180_v61 = vsel %vm591_vm2, %v1864_v59, 0.0 }
 0x561   : > { %1683 = vmatprep.mubr.msk.f32.mxu1 %vm2229_vm0, %v2230_v1  ;;  %1691 = vmatprep.subr.mxu1 %v2230_v1 }
 0x563   : > { %1684 = vmatmul.mubr.msk.f32.vlgmr.msra.gmra.mrb[8].mxu1 %vm591_vm2, %v1860_v48  ;;  %v1614_v48 = vld [vmem:[#allocation17] ss:$0 sm:$0xff] }
 0x564   : > { %1692 = vmatpush3.msra.mxu1 %v1184_v60  ;;  %1181 = vadd.xlane.f32.xlu0 %v1180_v61 }
 0x565   : > { %1693 = vmatprep.mubr.msk.f32.mxu1 %vm2229_vm0, %v2230_v1  ;;  %v1275_v1 = vld [vmem:[#allocation9] sm:$0xff] }
 0x566   : > { %v1714_v11 = vpack.c.bf16 %v1276_v9, %v1275_v1 }
 0x567   : > { %1694 = vmatmul.mubr.msk.f32.vlgmr.msra.gmra.mrb[10].mxu1 %vm591_vm2, %v1864_v59 }
 0x568   : > { %673 = vadd.xlane.f32.xlu0 %v672_v62  ;;  %1715 = vmatpush3.bf16.msra.mxu0 %v1714_v11 }
 0x569   : > { %1716 = vmatprep.subr.bf16.mxu0 %v2228_v0 }
 0x56c   : > { %1718 = vmatpush3.bf16.msra.mxu0 %v1717_v17 }
 0x584   : > { %v1011_v7 = vpop.xlane.xlu1 %1010 }
 0x5ed   : > { %v840_v2 = vpop.xlane.xlu0 %839 }
 0x5f1   : > { %v1182_v3 = vpop.xlane.xlu0 %1181 }
 0x5f5   : > { %v674_v4 = vpop.xlane.xlu0 %673 }
 0x5f6   : > { %1865 = vrcp.f32 %v674_v4 }
 0x5f7   : > { %1867 = vrcp.f32 %v840_v2 }
 0x5f8   : > { %1869 = vrcp.f32 %v1011_v7 }
 0x5f9   : > { %1871 = vrcp.f32 %v1182_v3 }
 0x600   : > { %v1866_v5 = vpop.eup %1865 }
 0x601   : > { %v752_v6 = vmul.f32 %v1866_v5, %v747_v39  ;;  %v1868_v13 = vpop.eup %1867 }
 0x602   : > { %v1870_v18 = vpop.eup %1869 }
 0x603   : > { %753 = vst.msk [vmem:[#allocation2] sm:$0xff] %vm591_vm2, %v752_v6  ;;  %v1872_v22 = vpop.eup %1871 }
 0x632   : > { %v913_v14 = vpop.f32.mrb[6].mxu1 }
 0x633   : > { %v918_v15 = vmul.f32 %v1868_v13, %v913_v14  ;;  %v1675_v16 = vpop.f32.mrb[7].mxu1 }
 0x635   : > { %920 = vrot.lane.b32.xlu0 %v918_v15, %s2243_s13 }
 0x636   : > { %v1084_v19 = vpop.f32.mrb[8].mxu1 }
 0x637   : > { %v1089_v20 = vmul.f32 %v1870_v18, %v1084_v19  ;;  %v1685_v21 = vpop.f32.mrb[9].mxu1 }
 0x639   : > { %1091 = vrot.lane.b32.xlu1 %v1089_v20, %s2244_s14 }
 0x63a   : > { %v1255_v23 = vpop.f32.mrb[10].mxu1 }
 0x63b   : > { %v1260_v24 = vmul.f32 %v1872_v22, %v1255_v23  ;;  %v1695_v25 = vpop.f32.mrb[11].mxu1 }
 0x63d   : > { %1262 = vrot.lane.b32.xlu0 %v1260_v24, %s2245_s11 }
 0x641   : > { %1271 = vperm.xlu0 %1856, %v1268_v26  }
 0x6a7   : > { %v921_v0 = vpop.permute.xlu0 %920 }
 0x6a8   : > { %924 = vst.msk [vmem:[#allocation2] sm:$0xff] %vm923_vm3, %v921_v0 }
 0x6ab   : > { %v1092_v27 = vpop.permute.xlu1 %1091 }
 0x6ac   : > { %1095 = vst.msk [vmem:[#allocation2] sm:$0xff] %vm1094_vm4, %v1092_v27 }
 0x6af   : > { %v1263_v28 = vpop.permute.xlu0 %1262 }
 0x6b0   : > { %1266 = vst.msk [vmem:[#allocation2] sm:$0xff] %vm1265_vm5, %v1263_v28 }
 0x6b7   : > { %v1267_v29 = vld [vmem:[#allocation2] sm:$0xff] }
 0x6c0   : > { %v1272_v30 = vpop.permute.xlu0 %1271 }
 0x6c1   : > { %v1274_v31 = vmul.f32 %v1272_v30, %v1267_v29 }
 0x6c3   : > { %1705 = vmatmul.mubr.msk.f32.vlgmr.msra.gmra.mrb[6].mxu0 %vm507_vm1, %v1274_v31 }
 0x796   : > { %v1355_v33 = vpop.f32.mrb[6].mxu0 }
 0x797   : > { %v1356_v34 = vadd.f32 %v1611_v32, %v1355_v33  ;;  %v1706_v35 = vpop.f32.mrb[7].mxu0 }
 0x799   : > { %v1359_v36 = vadd.f32 %v1356_v34, %v2653_v8  ;;  %v1613_v8 = vld [vmem:[#allocation15] ss:$0 sm:$0xff] }
 0x79b   : > { %v1360_v37 = vsel %vm507_vm1, %v1359_v36, 0.0 }
 0x79c   : > { %1361 = vadd.xlane.f32.xlu1 %v1360_v37 }
 0x829   : > { %v1362_v38 = vpop.xlane.xlu1 %1361 }
 0x82a   : > { %v1364_v39 = vmul.f32 0.03125, %v1362_v38 }
 0x82c   : > { %v1365_v40 = vsub.f32 %v1359_v36, %v1364_v39 }
 0x82e   : > { %v1366_v41 = vmul.f32 %v1365_v40, %v1365_v40 }
 0x830   : > { %v1367_v42 = vsel %vm507_vm1, %v1366_v41, 0.0 }
 0x831   : > { %1368 = vadd.xlane.f32.xlu0 %v1367_v42 }
 0x8be   : > { %v1369_v43 = vpop.xlane.xlu0 %1368 }
 0x8bf   : > { %v1370_v44 = vmul.f32 0.03125, %v1369_v43 }
 0x8c1   : > { %v1371_v45 = vadd.f32 1e-05, %v1370_v44 }
 0x8c3   : > { %1873 = vrsqrt.f32 %v1371_v45 }
 0x8cd   : > { %v1874_v46 = vpop.eup %1873 }
 0x8ce   : > { %v1373_v47 = vmul.f32 %v1874_v46, %v1365_v40 }
 0x8d0   : > { %v1381_v49 = vmul.f32 %v1613_v8, %v1373_v47 }
 0x8d2   : > { %v1389_v50 = vadd.f32 %v1614_v48, %v1381_v49 }
 0x8d4   : > { %1390 = vst.msk [vmem:[%s494_s7] sm:$0xff] %vm507_vm1, %v1389_v50 }
 0x8d5   : > { %2146 = shalt.err (!%p2143_p1)
}
 0x8d6   : > { %s2147_s20 = scalar_lea.hbm %s2730_s3, 128  ;;  %s2151_s1 = scalar_lea.hbm %s2836_s21, 256 }
 0x8d7   : > { %p2148_p6 = scmp.ne.s32.totalorder %s2730_s3, %s2147_s20  ;;  %p2152_p9 = scmp.lt.u32.totalorder %s2730_s3, %s2836_s21 }
 0x8d8   : > { %p2153_p11 = scmp.lt.u32.totalorder %s2151_s1, %s2147_s20  ;;  %p2155_p0 = scmp.lt.u32.totalorder %s2147_s20, %s2730_s3 }
 0x8d9   : > { %p2149_p13 = pnand %p2148_p6, %p2837_p8 }
 0x8da   : > { %p2154_p3 = por %p2153_p11, %p2152_p9 }
 0x8db   : > { %p2150_p5 = pneg %p2149_p13 }
 0x8dc   : > { %p2156_p2 = por %p2155_p0, %p2154_p3 }
 0x8de   : > { %p2157_p4 = pnand %p2156_p2, %p2150_p5 }
 0x8e0   : > { %2160 = shalt.err (!%p2157_p4)
}
 0x8e1   : > { %1749 = dma.vmem_to_hbm [thread:$0]  (%p2837_p8), %s2732_s16, 128, %s2730_s3, %s1392_s9  }
 0x8e2 PF: > { %s2838_s27 = sld [smem:[#allocation28_spill]]  ;;  %s1417_s13 = sand.u32 1, %s2203_s30  }
 0x8e3   : > { %p2840_p12 = scmp.ge.s32.totalorder %s2215_s12, 2  ;;  %s1418_s14 = scalar_lea.sflag [#allocation5], %s1417_s13 }
 0x8e8   : > { %p2839_p7 = scmp.ne.s32.totalorder %s2838_s27, 0 }
 0x8ea   : > { %p1781_p10 = pnand %p2840_p12, %p2839_p7 }
 0x8ec   : > { %2198 = dma.done.wait (!%p1781_p10), %s1418_s14, 128  }
 0x8ed   : > { %2200 = vsyncadd (!%p1781_p10), %s1418_s14, 4294967168  ;;  %s2841_s12 = sld [smem:[#allocation26_spill]]  ;;  %s2842_s11 = sld [smem:[#allocation25_spill]] }
 0x8ee   : > { %s2843_s23 = sld [smem:[#allocation27_spill]]  ;;  %s2844_s30 = smov %s2207_s10 }
 0x8f3   : > { %p28_p1 = scmp.ge.s32.totalorder %s2841_s12, 4   ;;  %s2845_s10 = smov %s2842_s11 }
 0x8f4   : > { %s2846_s11 = smov %s2843_s23 }
 0x8f5   :  { %30 = sbr.rel (!%p28_p1) target bundleno = 16 (0x10), region = 149 }
 0x8fc   :  { %1423 = vsyncpa [#allocation4], 1 }
 0x8fd   :  { %1425 = vsyncpa [#allocation4 + $0x1], 1 }
 0x8fe   :  { %1426 = vsyncpa [#allocation7], 1 }
 0x8ff   :  { %1427 = vsyncpa [#allocation10], 1 }
 0x900   :  { %1428 = vsyncpa [#allocation13], 1 }
 0x901   :  { %1430 = vsyncpa [#allocation13 + $0x1], 1 }
 0x902   :  { %1431 = vsyncpa [#allocation16], 1 }
 0x903   :  { %1432 = vsyncpa [#allocation5], 1 }
 0x904   :  { %1434 = vsyncpa [#allocation5 + $0x1], 1 }

</bundles_post_ra>
